<compile_context>
chip_gen: v7x
topology: tpu7x:2x2x1
jax: 0.10.0
libtpu: 0.0.40
codegen_flags: <defaults>
</compile_context>

<pallas_src>
import jax
import jax.numpy as jnp
from jax.experimental import pallas as pl
from jax.experimental.pallas import tpu as pltpu


def _round_up(a, b):
    return (a + b - 1) // b * b


def _make_kernel(true_hw, thw, needs_mask):
    inv_hw = 1.0 / float(true_hw)

    def kernel(x_ref, w1_ref, w2_ref, o_ref, max_acc, sum_acc):
        # x_ref: (1, C, THW), w1_ref: (C, Cr), w2_ref: (Cr, C), o_ref: (1, 1, C)
        # max_acc / sum_acc: (1, C) f32 scratch, persistent across the k axis.
        k = pl.program_id(1)

        @pl.when(k == 0)
        def _init():
            max_acc[...] = jnp.full_like(max_acc, -jnp.inf)
            sum_acc[...] = jnp.zeros_like(sum_acc)

        tile = x_ref[...]                                   # (1, C, THW), input dtype

        if needs_mask:
            # Mask the zero-padded tail of the spatial axis for the max.
            col = jax.lax.broadcasted_iota(jnp.int32, tile.shape, 2) + k * thw
            tile_for_max = jnp.where(col < true_hw, tile,
                                     jnp.array(-jnp.inf, dtype=tile.dtype))
        else:
            tile_for_max = tile

        # Per-tile reductions: max in the input dtype, sum accumulated in f32.
        max_acc[...] = jnp.maximum(
            max_acc[...], jnp.max(tile_for_max, axis=-1).astype(jnp.float32))
        sum_acc[...] = sum_acc[...] + jnp.sum(tile, axis=-1, dtype=jnp.float32)

        @pl.when(k == pl.num_programs(1) - 1)
        def _finalize():
            max_r = max_acc[...]                            # (1, C) f32
            avg_r = sum_acc[...] * inv_hw                   # (1, C) f32, true mean
            # Shared SE MLP applied once to the stacked [max; avg] rows.
            v = jnp.concatenate([max_r, avg_r], axis=0)     # (2, C)
            w1 = w1_ref[...].astype(jnp.float32)            # (C, Cr)
            w2 = w2_ref[...].astype(jnp.float32)            # (Cr, C)
            h = jnp.maximum(
                jnp.dot(v, w1, preferred_element_type=jnp.float32), 0.0)   # (2, Cr)
            y = jnp.dot(h, w2, preferred_element_type=jnp.float32)         # (2, C)
            # Row 0 = se(max), row 1 = se(avg): their sum is max_out + avg_out.
            out = jax.nn.sigmoid(jnp.sum(y, axis=0, keepdims=True))        # (1, C)
            o_ref[0] = out.astype(o_ref.dtype)

    return kernel


def channel_attention(x, w1, w2, *, thw_target=2048):
    """x: (B, C, H, W) NCHW. w1: (C, C//r), w2: (C//r, C). Returns (B, C, 1, 1)."""
    B, C, H, W = x.shape
    Cr = w1.shape[1]
    HW = H * W

    # Spatial tile width: lane-aligned (multiple of 128), capped so small inputs
    # still use a single tile.  For larger HW this gives 512-2048-wide tiles
    # that amortize the per-grid-step pipeline overhead.
    THW = min(_round_up(HW, 128), _round_up(thw_target, 128))
    HW_pad = _round_up(HW, THW)
    num_k = HW_pad // THW

    x_flat = x.reshape(B, C, HW)
    if HW_pad != HW:
        # Zero padding is harmless for the sum; the max is masked in-kernel.
        x_flat = jnp.pad(x_flat, ((0, 0), (0, 0), (0, HW_pad - HW)))

    # Explicit VMEM budget: double-buffered x tile + weights + accumulators,
    # with headroom; capped so it stays safe on v7x's smaller VMEM.
    itemsize = jnp.dtype(x.dtype).itemsize
    w_itemsize = jnp.dtype(w1.dtype).itemsize
    est = (2 * C * THW * itemsize               # double-buffered input tile
           + 2 * (C * Cr + Cr * C) * w_itemsize  # weights
           + 4 * C * 4                           # f32 accumulators
           + 2 * C * itemsize)                   # output block
    vmem_limit = int(min(max(4 * est, 16 * 2 ** 20), 48 * 2 ** 20))

    kernel = _make_kernel(HW, THW, HW_pad != HW)

    out = pl.pallas_call(
        kernel,
        out_shape=jax.ShapeDtypeStruct((B, 1, C), x.dtype),
        grid_spec=pltpu.PrefetchScalarGridSpec(
            num_scalar_prefetch=0,
            grid=(B, num_k),                     # reduction axis (spatial) last
            in_specs=[
                pl.BlockSpec((1, C, THW), lambda b, k: (b, 0, k)),
                # Constant block indices: weights should be fetched once, not
                # per grid step (tiny either way).
                pl.BlockSpec((C, Cr), lambda b, k: (0, 0)),
                pl.BlockSpec((Cr, C), lambda b, k: (0, 0)),
            ],
            out_specs=pl.BlockSpec((1, 1, C), lambda b, k: (b, 0, 0)),
            scratch_shapes=[
                pltpu.VMEM((1, C), jnp.float32),   # running max
                pltpu.VMEM((1, C), jnp.float32),   # running sum
            ],
        ),
        compiler_params=pltpu.CompilerParams(
            dimension_semantics=("parallel", "arbitrary"),
            vmem_limit_bytes=vmem_limit,
        ),
    )(x_flat, w1, w2)

    return out.reshape(B, C, 1, 1)


def reference_channel_attention(x, w1, w2):
    """Pure-JAX reference matching the PyTorch forward exactly."""
    max_r = jnp.max(x, axis=(2, 3))          # (B, C)
    avg_r = jnp.mean(x, axis=(2, 3))         # (B, C)

    def se(v):
        h = jnp.maximum(v @ w1, 0.0)
        return h @ w2

    return jax.nn.sigmoid(se(max_r) + se(avg_r))[:, :, None, None]


if __name__ == "__main__":
    key = jax.random.PRNGKey(0)

    # Case 1: channel=64, reduction=16 (hidden=4), 16x16 spatial.
    # thw_target=128 -> 2 spatial tiles, exercising init/accumulate/finalize.
    B, C, H, W = 2, 64, 16, 16
    reduction = 16
    Cr = C // reduction
    kx, k1, k2 = jax.random.split(key, 3)
    x = jax.random.normal(kx, (B, C, H, W), dtype=jnp.float32)
    w1 = jax.random.normal(k1, (C, Cr), dtype=jnp.float32) * (2.0 / C) ** 0.5
    w2 = jax.random.normal(k2, (Cr, C), dtype=jnp.float32) * (2.0 / Cr) ** 0.5

    out = jax.block_until_ready(channel_attention(x, w1, w2, thw_target=128))
    ref = reference_channel_attention(x, w1, w2)
    assert out.shape == (B, C, 1, 1), out.shape
    assert jnp.allclose(out, ref, atol=1e-5, rtol=1e-5), "case 1 mismatch vs reference"

    # Case 2: 10x10 spatial (HW=100 not a multiple of 128) exercises the
    # zero-padded, masked-max tail path.
    B2, C2, H2, W2 = 2, 32, 10, 10
    Cr2 = C2 // 16
    kx2, k12, k22 = jax.random.split(jax.random.PRNGKey(1), 3)
    x2 = jax.random.normal(kx2, (B2, C2, H2, W2), dtype=jnp.float32)
    w12 = jax.random.normal(k12, (C2, Cr2), dtype=jnp.float32) * (2.0 / C2) ** 0.5
    w22 = jax.random.normal(k22, (Cr2, C2), dtype=jnp.float32) * (2.0 / Cr2) ** 0.5

    out2 = jax.block_until_ready(channel_attention(x2, w12, w22))
    ref2 = reference_channel_attention(x2, w12, w22)
    assert out2.shape == (B2, C2, 1, 1), out2.shape
    assert jnp.allclose(out2, ref2, atol=1e-5, rtol=1e-5), "case 2 mismatch vs reference"

    print("KERNEL_OK")
</pallas_src>

<mosaic_0001>
module attributes {stable_mosaic.version = 11 : i64} {
  func.func @kernel(%arg0: i32, %arg1: i32, %arg2: memref<1x64x128xf32, #tpu.memory_space<vmem>>, %arg3: memref<64x4xf32, #tpu.memory_space<vmem>>, %arg4: memref<4x64xf32, #tpu.memory_space<vmem>>, %arg5: memref<1x1x64xf32, #tpu.memory_space<vmem>>, %arg6: memref<1x64xf32, #tpu.memory_space<vmem>>, %arg7: memref<1x64xf32, #tpu.memory_space<vmem>>) attributes {dimension_semantics = [#tpu.dimension_semantics<parallel>, #tpu.dimension_semantics<arbitrary>], iteration_bounds = array<i64: 2, 2>, scalar_prefetch = 0 : i64, scratch_operands = 2 : i64, tpu.core_type = #tpu.core_type<tc>, window_params = [{transform_indices = @transform_0, window_bounds = array<i64: 1, 64, 128>}, {pipeline_mode = #tpu.pipeline_mode<synchronous>, transform_indices = @transform_1, window_bounds = array<i64: 64, 4>}, {pipeline_mode = #tpu.pipeline_mode<synchronous>, transform_indices = @transform_2, window_bounds = array<i64: 4, 64>}, {transform_indices = @transform_3, window_bounds = array<i64: 1, 1, 64>}]} {
    %c0_i32 = arith.constant 0 : i32
    %0 = arith.cmpi eq, %arg1, %c0_i32 : i32
    %1 = arith.extui %0 : i1 to i32
    %c0_i32_0 = arith.constant 0 : i32
    %2 = arith.cmpi ne, %1, %c0_i32_0 : i32
    scf.if %2 {
      %cst_13 = arith.constant 0xFF800000 : f32
      %15 = vector.broadcast %cst_13 : f32 to vector<1x64xf32>
      %c0_14 = arith.constant 0 : index
      %c0_15 = arith.constant 0 : index
      %16 = vector.load %arg6[%c0_14, %c0_15] : memref<1x64xf32, #tpu.memory_space<vmem>>, vector<1x64xf32>
      tpu.vector_store %arg6[%c0_14, %c0_15], %15 {strides = array<i32>} : memref<1x64xf32, #tpu.memory_space<vmem>>, vector<1x64xf32>,
      %cst_16 = arith.constant 0.000000e+00 : f32
      %17 = vector.broadcast %cst_16 : f32 to vector<1x64xf32>
      %c0_17 = arith.constant 0 : index
      %c0_18 = arith.constant 0 : index
      %18 = vector.load %arg7[%c0_17, %c0_18] : memref<1x64xf32, #tpu.memory_space<vmem>>, vector<1x64xf32>
      tpu.vector_store %arg7[%c0_17, %c0_18], %17 {strides = array<i32>} : memref<1x64xf32, #tpu.memory_space<vmem>>, vector<1x64xf32>,
    } else {
    }
    %c0 = arith.constant 0 : index
    %c0_1 = arith.constant 0 : index
    %c0_2 = arith.constant 0 : index
    %3 = vector.load %arg2[%c0, %c0_1, %c0_2] : memref<1x64x128xf32, #tpu.memory_space<vmem>>, vector<1x64x128xf32>
    %c0_3 = arith.constant 0 : index
    %c0_4 = arith.constant 0 : index
    %4 = vector.load %arg6[%c0_3, %c0_4] : memref<1x64xf32, #tpu.memory_space<vmem>>, vector<1x64xf32>
    %cst = arith.constant dense<0xFF800000> : vector<1x64xf32>
    %5 = vector.multi_reduction <maximumf>, %3, %cst [2] : vector<1x64x128xf32> to vector<1x64xf32>
    %6 = arith.maximumf %4, %5 : vector<1x64xf32>
    %c0_5 = arith.constant 0 : index
    %c0_6 = arith.constant 0 : index
    %7 = vector.load %arg6[%c0_5, %c0_6] : memref<1x64xf32, #tpu.memory_space<vmem>>, vector<1x64xf32>
    tpu.vector_store %arg6[%c0_5, %c0_6], %6 {strides = array<i32>} : memref<1x64xf32, #tpu.memory_space<vmem>>, vector<1x64xf32>,
    %c0_7 = arith.constant 0 : index
    %c0_8 = arith.constant 0 : index
    %8 = vector.load %arg7[%c0_7, %c0_8] : memref<1x64xf32, #tpu.memory_space<vmem>>, vector<1x64xf32>
    %cst_9 = arith.constant dense<0.000000e+00> : vector<1x64xf32>
    %9 = vector.multi_reduction <add>, %3, %cst_9 [2] : vector<1x64x128xf32> to vector<1x64xf32>
    %10 = arith.addf %8, %9 : vector<1x64xf32>
    %c0_10 = arith.constant 0 : index
    %c0_11 = arith.constant 0 : index
    %11 = vector.load %arg7[%c0_10, %c0_11] : memref<1x64xf32, #tpu.memory_space<vmem>>, vector<1x64xf32>
    tpu.vector_store %arg7[%c0_10, %c0_11], %10 {strides = array<i32>} : memref<1x64xf32, #tpu.memory_space<vmem>>, vector<1x64xf32>,
    %c1_i32 = arith.constant 1 : i32
    %12 = arith.cmpi eq, %arg1, %c1_i32 : i32
    %13 = arith.extui %12 : i1 to i32
    %c0_i32_12 = arith.constant 0 : i32
    %14 = arith.cmpi ne, %13, %c0_i32_12 : i32
    scf.if %14 {
      %c0_13 = arith.constant 0 : index
      %c0_14 = arith.constant 0 : index
      %15 = vector.load %arg6[%c0_13, %c0_14] : memref<1x64xf32, #tpu.memory_space<vmem>>, vector<1x64xf32>
      %c0_15 = arith.constant 0 : index
      %c0_16 = arith.constant 0 : index
      %16 = vector.load %arg7[%c0_15, %c0_16] : memref<1x64xf32, #tpu.memory_space<vmem>>, vector<1x64xf32>
      %cst_17 = arith.constant 3.906250e-03 : f32
      %17 = vector.broadcast %cst_17 : f32 to vector<1x64xf32>
      %18 = arith.mulf %16, %17 : vector<1x64xf32>
      %19 = tpu.concatenate %15, %18 in 0 : vector<1x64xf32>, vector<1x64xf32> -> vector<2x64xf32>
      %c0_18 = arith.constant 0 : index
      %c0_19 = arith.constant 0 : index
      %20 = vector.load %arg3[%c0_18, %c0_19] : memref<64x4xf32, #tpu.memory_space<vmem>>, vector<64x4xf32>
      %c0_20 = arith.constant 0 : index
      %c0_21 = arith.constant 0 : index
      %21 = vector.load %arg4[%c0_20, %c0_21] : memref<4x64xf32, #tpu.memory_space<vmem>>, vector<4x64xf32>
      %cst_22 = arith.constant dense<0.000000e+00> : vector<2x4xf32>
      %22 = tpu.matmul %19, %20, %cst_22 {dimension_numbers = #tpu.dot_dimension_numbers<[1], [0], [0], [1], [0, 0, 1, 1], [], []>} : vector<2x64xf32>, vector<64x4xf32>, vector<2x4xf32> -> vector<2x4xf32>
      %cst_23 = arith.constant 0.000000e+00 : f32
      %23 = vector.broadcast %cst_23 : f32 to vector<2x4xf32>
      %24 = arith.maximumf %22, %23 : vector<2x4xf32>
      %cst_24 = arith.constant dense<0.000000e+00> : vector<2x64xf32>
      %25 = tpu.matmul %24, %21, %cst_24 {dimension_numbers = #tpu.dot_dimension_numbers<[1], [0], [0], [1], [0, 0, 1, 1], [], []>} : vector<2x4xf32>, vector<4x64xf32>, vector<2x64xf32> -> vector<2x64xf32>
      %cst_25 = arith.constant dense<0.000000e+00> : vector<64xf32>
      %26 = vector.multi_reduction <add>, %25, %cst_25 [0] : vector<2x64xf32> to vector<64xf32>
      %27 = vector.shape_cast %26 : vector<64xf32> to vector<1x64xf32>
      %28 = arith.negf %27 : vector<1x64xf32>
      %29 = math.exp %28 : vector<1x64xf32>
      %cst_26 = arith.constant 1.000000e+00 : f32
      %30 = vector.broadcast %cst_26 : f32 to vector<1x64xf32>
      %31 = arith.addf %30, %29 : vector<1x64xf32>
      %32 = arith.divf %30, %31 : vector<1x64xf32>
      %c0_27 = arith.constant 0 : index
      %c0_28 = arith.constant 0 : index
      %c0_29 = arith.constant 0 : index
      %33 = vector.load %arg5[%c0_27, %c0_28, %c0_29] : memref<1x1x64xf32, #tpu.memory_space<vmem>>, vector<1x1x64xf32>
      %34 = vector.shape_cast %33 : vector<1x1x64xf32> to vector<1x64xf32>
      %35 = vector.shape_cast %32 : vector<1x64xf32> to vector<1x1x64xf32>
      tpu.vector_store %arg5[%c0_27, %c0_28, %c0_29], %35 {strides = array<i32>} : memref<1x1x64xf32, #tpu.memory_space<vmem>>, vector<1x1x64xf32>,
    } else {
    }
    return
  }
  func.func @transform_0(%arg0: i32, %arg1: i32) -> (i32, i32, i32) {
    %c0_i32 = arith.constant 0 : i32
    %c0_i32_0 = arith.constant 0 : i32
    return %arg0, %c0_i32, %arg1 : i32, i32, i32
  }
  func.func @transform_1(%arg0: i32, %arg1: i32) -> (i32, i32) {
    %c0_i32 = arith.constant 0 : i32
    %c0_i32_0 = arith.constant 0 : i32
    %c0_i32_1 = arith.constant 0 : i32
    return %c0_i32, %c0_i32_0 : i32, i32
  }
  func.func @transform_2(%arg0: i32, %arg1: i32) -> (i32, i32) {
    %c0_i32 = arith.constant 0 : i32
    %c0_i32_0 = arith.constant 0 : i32
    %c0_i32_1 = arith.constant 0 : i32
    return %c0_i32, %c0_i32_0 : i32, i32
  }
  func.func @transform_3(%arg0: i32, %arg1: i32) -> (i32, i32, i32) {
    %c0_i32 = arith.constant 0 : i32
    %c0_i32_0 = arith.constant 0 : i32
    %c0_i32_1 = arith.constant 0 : i32
    return %arg0, %c0_i32, %c0_i32_0 : i32, i32, i32
  }
}

</mosaic_0001>

<bundles_post_ra>
// kernel: tpu_custom_call.1
= control target key start
LH: loop header
LB: loop body
LE: loop exit
PB: predicated region body
PF: predicated region fallthrough
CT: control target
= control target key end

     0   :  { %8 = vsyncpa [#allocation5], 0  ;;  %s3001_s0 = inlined_call_operand.hbm [shape: f32[2,64,256], index: 0, kind: input, shape index: {}]   ;;  %s3002_s1 = inlined_call_operand.vmem [shape: f32[64,4], index: 1, kind: input, shape index: {}]   ;;  %s3003_s2 = inlined_call_operand.vmem [shape: f32[4,64], index: 2, kind: input, shape index: {}]   ;;  %s3004_s3 = inlined_call_operand.hbm [shape: f32[2,1,64], index: 3, kind: output, shape index: {}]  }
   0x1   :  { %10 = vsyncpa [#allocation5 + $0x1], 0 }
   0x2   :  { %11 = vsyncpa [#allocation6], 0 }
   0x3   :  { %13 = vsyncpa [#allocation6 + $0x1], 0  ;;  %s2394_s12 = smov 0   ;;  %s2396_s13 = smov 0  }
   0x4   :  { %s2398_s14 = smov 0   ;;  %s2400_s15 = smov 0  }
   0x5   :  { %s2402_s16 = smov 0   ;;  %s2404_s17 = smov 0  }
   0x6   :  { %s2406_s18 = smov 0   ;;  %s2408_s19 = smov 0  }
   0x7   :  { %s2410_s20 = smov 0   ;;  %s2412_s21 = smov 0  }
   0x8   :  { %s2414_s22 = smov 0  }
   0x9 LB: > { %s2025_s23 = sadd.s32 4294967295, %s2360_s22   ;;  %s2026_s24 = sadd.s32 4294967294, %s2360_s22   ;;  %s2360_s22 = sphi %s2414_s22, %s19_s22   ;;  %s2356_s21 = sphi %s2412_s21, %s3028_s21   ;;  %s2352_s20 = sphi %s2410_s20, %s3027_s20   ;;  %s2348_s19 = sphi %s2408_s19, %s3026_s19   ;;  %s2344_s18 = sphi %s2406_s18, %s3025_s18   ;;  %s2340_s17 = sphi %s2404_s17, %s3024_s17   ;;  %s2336_s16 = sphi %s2402_s16, %s3023_s16   ;;  %s2332_s15 = sphi %s2400_s15, %s3022_s15   ;;  %s2328_s14 = sphi %s2398_s14, %s3021_s14   ;;  %s2324_s13 = sphi %s2396_s13, %s3020_s13   ;;  %s2320_s12 = sphi %s2394_s12, %s3019_s12  }
   0xa   : > { %s28_s25 = sadd.s32 1, %s2352_s20  ;;  %s31_s26 = sadd.s32 1, %s2356_s21 }
   0xb   : > { %p29_p0 = scmp.ge.s32.totalorder %s28_s25, 2  ;;  %s40_s27 = sadd.s32 1, %s2340_s17 }
   0xc   : > { %p47_p1 = scmp.ne.s32.totalorder %s2340_s17, %s2336_s16  ;;  %p48_p2 = scmp.eq.s32.totalorder %s2360_s22, 0 }
   0xd   : > { %s3030_s25 = smov (%p29_p0, %s28_s25), 0  ;;  %s3032_s26 = smov (!%p29_p0, %s31_s26), %s2356_s21 }
   0xe   : > { %3008 = sst [smem:[#allocation10_spill]] %s3030_s25  ;;  %s36_s28 = ssub.s32 %s2352_s20, %s3030_s25 }
   0xf   : > { %p2460_p3 = por %p48_p2, %p47_p1  ;;  %p33_p4 = scmp.ge.s32.totalorder %s3032_s26, 2 }
  0x10   : > { %p53_p5 = scmp.ne.s32.totalorder %s2336_s16, %s2332_s15  ;;  %p54_p6 = scmp.eq.s32.totalorder %s2025_s23, 0 }
  0x11   : > { %s108_s30 = sadd.s32 1, %s2328_s14  ;;  %s3034_s26 = smov (%p33_p4, %s3032_s26), 0 }
  0x12   : > { %3010 = sst [smem:[#allocation11_spill]] %s3034_s26  ;;  %p2468_p7 = por %p54_p6, %p53_p5 }
  0x13   : > { %p118_p8 = scmp.ne.s32.totalorder %s2328_s14, %s2324_s13  ;;  %s35_s5 = ssub.s32 %s2356_s21, %s3034_s26 }
  0x14   : > { %p119_p9 = scmp.eq.s32.totalorder %s2025_s23, 3  ;;  %s37_s6 = sor.u32 %s36_s28, %s35_s5 }
  0x15   : > { %p106_p10 = scmp.eq.s32.totalorder %s35_s5, 0  ;;  %p38_p11 = scmp.eq.s32.totalorder %s37_s6, 0 }
  0x16   : > { %p2476_p12 = por %p119_p9, %p118_p8  ;;  %p124_p13 = scmp.ne.s32.totalorder %s2324_s13, %s2320_s12 }
  0x17   : > { %s2481_s8 = scalar_select %p106_p10, %s2328_s14, %s108_s30  }
  0x18   : > { %s3012_s7 = scalar_select %p2476_p12, 1, 0 }
  0x19   : > { %s2484_s9 = scalar_select %p38_p11, %s2340_s17, %s40_s27  }
  0x1a   : > { %p125_p0 = scmp.eq.s32.totalorder %s2026_s24, 3  ;;  %p2102_p1 = scmp.lt.s32.totalorder %s2360_s22, 4 }
  0x1b   : > { %s151_s11 = sand.u32 1, %s2340_s17   ;;  %s2030_s23 = sshll.u32 %s2356_s21, 4 }
  0x1c   : > { %p2489_p2 = por %p125_p0, %p124_p13  ;;  %s2029_s15 = sshll.u32 %s151_s11, 6 }
  0x1d   : > { %s160_s28 = sadd.s32 %s2352_s20, %s2030_s23  ;;  %s155_s5 = scalar_lea.vmem [#allocation4], %s2029_s15 }
  0x1e   : > { %s3013_s10 = scalar_select %p2489_p2, 1, 0 }
  0x1f   : > { %s163_s6 = sshll.u32 %s155_s5, 4  ;;  %s2031_s26 = sshll.u32 %s160_s28, 7  ;;  %s2496_s6 = int_to_ptr.vmem [resolvable:$true] %s163_s6 }
  0x20   : > { %s2501_s27 = scalar_lea.hbm %s3001_s0, %s2031_s26  ;;  %p2505_p4 = pnand %p2102_p1, %p2460_p3 }
  0x21   : > { %s2509_s15 = scalar_lea.sflag [#allocation5], %s151_s11  ;;  %s2208_s23 = scalar_lea.hbm %s2501_s27, 1024 }
  0x22   : > { %p2209_p5 = scmp.ne.s32.totalorder %s2501_s27, %s2208_s23  ;;  %p2210_p6 = pneg %p2505_p4 }
  0x23   : > { %s2213_s29 = scalar_lea.hbm %s3001_s0, 4096  ;;  %p2214_p3 = scmp.lt.u32.totalorder %s2501_s27, %s3001_s0 }
  0x24   : > { %p2211_p8 = pnand %p2210_p6, %p2209_p5  ;;  %p2215_p10 = scmp.lt.u32.totalorder %s2213_s29, %s2208_s23 }
  0x25   : > { %p2217_p13 = scmp.lt.u32.totalorder %s2208_s23, %s2501_s27 }
  0x26   : > { %p2212_p9 = pneg %p2211_p8  ;;  %p2216_p11 = por %p2215_p10, %p2214_p3 }
  0x28   : > { %p2218_p0 = por %p2217_p13, %p2216_p11 }
  0x2a   : > { %p2219_p1 = pnand %p2218_p0, %p2212_p9 }
  0x2c   : > { %2222 = shalt.err (!%p2219_p1)
}
  0x2d   : > { %s2223_s11 = scalar_lea.vmem %s2496_s6, 1024  ;;  %s2362_s30 = smov [#allocation4]  }
  0x2e   : > { %p2224_p5 = scmp.ne.s32.totalorder %s2496_s6, %s2223_s11  ;;  %s2228_s25 = sshll.u32 %s2362_s30, 4  ;;  %s2229_s25 = int_to_ptr.vmem [resolvable:$false] %s2228_s25 }
  0x2f   : > { %s2230_s26 = scalar_lea.vmem %s2229_s25, 2048  ;;  %p2231_p12 = scmp.lt.s32.totalorder %s2496_s6, %s2229_s25 }
  0x30   : > { %p2226_p8 = pnand %p2224_p5, %p2210_p6  ;;  %p2232_p3 = scmp.lt.s32.totalorder %s2230_s26, %s2223_s11 }
  0x32   : > { %p2227_p2 = pneg %p2226_p8  ;;  %p2233_p10 = por %p2232_p3, %p2231_p12 }
  0x34   : > { %p2234_p11 = pnand %p2233_p10, %p2227_p2 }
  0x36   : > { %2237 = shalt.err (!%p2234_p11)
}
  0x37   : > { %s2363_s23 = smov 256   ;;  %s2364_s29 = smov 128  }
  0x38   : > { %s2365_s28 = smov 8   ;;  %p2032_p6 = scmp.ge.s32.totalorder %s2360_s22, 1 }
  0x39   : > { %2097 = dma.hbm_to_vmem [thread:$0]  (!%p2505_p4), %s2501_s27, 1024, %s2496_s6, %s2509_s15, %s2363_s23, %s2364_s29, %s2365_s28  }
  0x3a   : > { %p171_p9 = scmp.lt.s32.totalorder %s2360_s22, 5 }
  0x3c   : > { %p172_p13 = pnand %p2032_p6, %p171_p9 }
  0x3d   : > { %s177_s5 = sand.u32 (!%p172_p13), 1, %s2336_s16  }
  0x3e   : > { %175 = sbr.rel (%p172_p13) target bundleno = 954 (0x3ba), region = 32  ;;  %s2033_s11 = sshll.u32 (!%p172_p13), %s177_s5, 6 }
  0x3f   : > { %s178_s30 = scalar_lea.sflag (!%p172_p13), [#allocation5], %s177_s5  ;;  %s2540_s25 = scalar_lea.vmem (!%p172_p13), [#allocation4], %s2033_s11 }
  0x45   : > { %2311 = dma.done.wait (%p2468_p7), %s178_s30, 1024  }
  0x46   : > { %2313 = vsyncadd (%p2468_p7), %s178_s30, 4294966272  ;;  %s201_s24 = sand.u32 1, %s2324_s13   ;;  %p2034_p12 = scmp.ne.s32.totalorder %s2344_s18, 0 }
  0x47   : > { %s2549_s6 = scalar_lea.vmem [#allocation7], %s201_s24  ;;  %vm207_vm0 = vcmask (!%p2034_p12), 516096   ;;  %v2366_v0 = vmov (!%p2034_p12), -inf   ;;  %v2367_v1 = vmov (!%p2034_p12), 0.0  }
  0x48   : > { %206 = sbr.rel (%p2034_p12) target bundleno = 79 (0x4f), region = 40  ;;  %208 = vst.msk [vmem:[#allocation2] sm:$0x1] (!%p2034_p12), %vm207_vm0, %v2366_v0  ;;  %209 = vst.msk [vmem:[#allocation3] sm:$0x1] (!%p2034_p12), %vm207_vm0, %v2367_v1 }
  0x4f PF: > { %v210_v2 = vld [vmem:[%s2540_s25] sm:$0xff]  ;;  %v211_v3 = vld [vmem:[%s2540_s25 + $0x8] sm:$0xff]  ;;  %v212_v4 = vld [vmem:[%s2540_s25 + $0x10] sm:$0xff]  ;;  %v2368_v9 = vmov 0   ;;  %v243_v11 = vlaneseq  ;;  %v2369_v12 = vmov 1966171168  }
  0x50   : > { %989 = vadd.xlane.f32.xlu1 %v210_v2  ;;  %219 = vmax.xlane.f32.xlu0 %v210_v2  ;;  %v213_v5 = vld [vmem:[%s2540_s25 + $0x18] sm:$0xff]  ;;  %v214_v6 = vld [vmem:[%s2540_s25 + $0x20] sm:$0xff]  ;;  %v215_v7 = vld [vmem:[%s2540_s25 + $0x28] sm:$0xff]  ;;  %v504_v13 = vunpack.c.l.s4 %v2369_v12  ;;  %vm926_vm1 = vcmask 130112   ;;  %vm933_vm2 = vcmask 195712   ;;  %vm947_vm3 = vcmask 326912  }
  0x51   : > { %v216_v8 = vld [vmem:[%s2540_s25 + $0x30] sm:$0xff]  ;;  %2202 = vset.pattern.permute.xlu0 %v2368_v9  ;;  %2203 = vset.pattern.permute.xlu1 %v2368_v9  ;;  %v217_v10 = vld [vmem:[%s2540_s25 + $0x38] sm:$0xff]  ;;  %v2561_v14 = vshrl.u32 %v243_v11, 7  ;;  %vm940_vm4 = vcmask 261312   ;;  %vm954_vm5 = vcmask 392512   ;;  %vm961_vm6 = vcmask 458112  }
  0x52   : > { %v505_v15 = vunpack.c.0.s8 %v504_v13  ;;  %vm968_vm7 = vcmask 523712   ;;  %vm986_vm8 = vcmask 516096   ;;  %p2035_p7 = scmp.ne.s32.totalorder %s2344_s18, 1 }
  0x53   : > { %v2564_v16 = vsub.s32 0, %v2561_v14  ;;  %v2567_v17 = vsub.s32 1, %v2561_v14  ;;  %v2570_v18 = vsub.s32 2, %v2561_v14  ;;  %v2573_v19 = vsub.s32 3, %v2561_v14 }
  0x54   : > { %991 = vadd.xlane.f32.xlu1 %v211_v3  ;;  %221 = vmax.xlane.f32.xlu0 %v211_v3  ;;  %v2576_v20 = vsub.s32 4, %v2561_v14  ;;  %v2579_v21 = vsub.s32 5, %v2561_v14  ;;  %v2582_v22 = vsub.s32 6, %v2561_v14  ;;  %v2585_v23 = vsub.s32 7, %v2561_v14 }
  0x55   : > { %v2590_v26 = vsub.s32 %v505_v15, %v2561_v14  ;;  %vm2371_vm9 = vmmov (!%p2035_p7), 0   ;;  %vm1754_vm10 = vcmask (!%p2035_p7), 1040384   ;;  %vm1765_vm11 = vcmask (!%p2035_p7), 523264  }
  0x56   : > { %vm1844_vm12 = vcmask (!%p2035_p7), 1043456   ;;  %vm1840_vm13 = vcmask (!%p2035_p7), 31744   ;;  %vm1918_vm14 = vcmask (!%p2035_p7), 517120  }
  0x58   : > { %993 = vadd.xlane.f32.xlu1 %v212_v4  ;;  %223 = vmax.xlane.f32.xlu0 %v212_v4 }
  0x5c   : > { %995 = vadd.xlane.f32.xlu1 %v213_v5  ;;  %225 = vmax.xlane.f32.xlu0 %v213_v5 }
  0x60   : > { %997 = vadd.xlane.f32.xlu1 %v214_v6  ;;  %227 = vmax.xlane.f32.xlu0 %v214_v6 }
  0x64   : > { %999 = vadd.xlane.f32.xlu1 %v215_v7  ;;  %229 = vmax.xlane.f32.xlu0 %v215_v7 }
  0x68   : > { %1001 = vadd.xlane.f32.xlu1 %v216_v8  ;;  %231 = vmax.xlane.f32.xlu0 %v216_v8 }
  0x6c   : > { %1003 = vadd.xlane.f32.xlu1 %v217_v10  ;;  %233 = vmax.xlane.f32.xlu0 %v217_v10 }
  0xdd   : > { %v2587_v24 = vpop.xlane.xlu1 %989  ;;  %v220_v25 = vpop.xlane.xlu0 %219 }
  0xde   : > { %v246_v27 = vrot.slane %v220_v25, %v2564_v16  ;;  %v250_v28 = vrot.slane %v220_v25, %v2567_v17  ;;  %v254_v29 = vrot.slane %v220_v25, %v2570_v18  ;;  %v258_v30 = vrot.slane %v220_v25, %v2573_v19 }
  0xdf   : > { %v262_v31 = vrot.slane %v220_v25, %v2576_v20  ;;  %v266_v32 = vrot.slane %v220_v25, %v2579_v21  ;;  %v270_v33 = vrot.slane %v220_v25, %v2582_v22  ;;  %v274_v34 = vrot.slane %v220_v25, %v2585_v23 }
  0xe0   : > { %v499_v35 = vcombine.low %v246_v27, %v250_v28  ;;  %v500_v36 = vcombine.low %v254_v29, %v258_v30  ;;  %v1016_v37 = vrot.slane %v2587_v24, %v2564_v16  ;;  %v1020_v38 = vrot.slane %v2587_v24, %v2567_v17 }
  0xe1   : > { %v2604_v39 = vpop.xlane.xlu1 %991  ;;  %v222_v40 = vpop.xlane.xlu0 %221  ;;  %v501_v41 = vcombine.low %v262_v31, %v266_v32  ;;  %v502_v42 = vcombine.low %v270_v33, %v274_v34  ;;  %v1024_v43 = vrot.slane %v2587_v24, %v2570_v18  ;;  %v1028_v44 = vrot.slane %v2587_v24, %v2573_v19 }
  0xe2   : > { %v509_v45 = vrot.slane %v499_v35, %v2590_v26  ;;  %v516_v46 = vrot.slane %v500_v36, %v2590_v26  ;;  %v278_v47 = vrot.slane %v222_v40, %v2564_v16  ;;  %v282_v48 = vrot.slane %v222_v40, %v2567_v17 }
  0xe3   : > { %v523_v49 = vrot.slane %v501_v41, %v2590_v26  ;;  %v530_v50 = vrot.slane %v502_v42, %v2590_v26  ;;  %v286_v51 = vrot.slane %v222_v40, %v2570_v18  ;;  %v290_v52 = vrot.slane %v222_v40, %v2573_v19 }
  0xe4   : > { %v531_v53 = vcombine.low %v509_v45, %v516_v46  ;;  %v294_v54 = vrot.slane %v222_v40, %v2576_v20  ;;  %v298_v55 = vrot.slane %v222_v40, %v2579_v21  ;;  %v302_v56 = vrot.slane %v222_v40, %v2582_v22 }
  0xe5   : > { %v2621_v57 = vpop.xlane.xlu1 %993  ;;  %v224_v58 = vpop.xlane.xlu0 %223  ;;  %v532_v59 = vcombine.low %v523_v49, %v530_v50  ;;  %v306_v60 = vrot.slane %v222_v40, %v2585_v23  ;;  %v548_v61 = vcombine.low %v278_v47, %v282_v48  ;;  %v549_v62 = vcombine.low %v286_v51, %v290_v52 }
  0xe6   : > { %v539_v63 = vrot.slane %v531_v53, %v2590_v26  ;;  %v550_v0 = vcombine.low %v294_v54, %v298_v55  ;;  %v310_v1 = vrot.slane %v224_v58, %v2564_v16  ;;  %v314_v2 = vrot.slane %v224_v58, %v2567_v17 }
  0xe7   : > { %v546_v3 = vrot.slane %v532_v59, %v2590_v26  ;;  %v551_v4 = vcombine.low %v302_v56, %v306_v60  ;;  %v558_v5 = vrot.slane %v548_v61, %v2590_v26  ;;  %v565_v6 = vrot.slane %v549_v62, %v2590_v26 }
  0xe8   : > { %v572_v7 = vrot.slane %v550_v0, %v2590_v26  ;;  %v318_v8 = vrot.slane %v224_v58, %v2570_v18  ;;  %v322_v9 = vrot.slane %v224_v58, %v2573_v19  ;;  %v326_v10 = vrot.slane %v224_v58, %v2576_v20 }
  0xe9   : > { %v2634_v12 = vpop.xlane.xlu1 %995  ;;  %v226_v13 = vpop.xlane.xlu0 %225  ;;  %v547_v15 = vcombine.low %v539_v63, %v546_v3  ;;  %v579_v25 = vrot.slane %v551_v4, %v2590_v26  ;;  %v580_v27 = vcombine.low %v558_v5, %v565_v6  ;;  %v330_v28 = vrot.slane %v224_v58, %v2579_v21 }
  0xea   : > { %v334_v29 = vrot.slane %v224_v58, %v2582_v22  ;;  %v338_v30 = vrot.slane %v224_v58, %v2585_v23  ;;  %v597_v31 = vcombine.low %v310_v1, %v314_v2  ;;  %v598_v32 = vcombine.low %v318_v8, %v322_v9 }
  0xeb   : > { %892 = vperm.xlu0 %2202, %v547_v15   ;;  %v581_v33 = vcombine.low %v572_v7, %v579_v25  ;;  %v588_v34 = vrot.slane %v580_v27, %v2590_v26  ;;  %v599_v35 = vcombine.low %v326_v10, %v330_v28  ;;  %v342_v36 = vrot.slane %v226_v13, %v2564_v16 }
  0xec   : > { %v600_v40 = vcombine.low %v334_v29, %v338_v30  ;;  %v607_v41 = vrot.slane %v597_v31, %v2590_v26  ;;  %v614_v42 = vrot.slane %v598_v32, %v2590_v26  ;;  %v346_v45 = vrot.slane %v226_v13, %v2567_v17 }
  0xed   : > { %v595_v46 = vrot.slane %v581_v33, %v2590_v26  ;;  %v621_v47 = vrot.slane %v599_v35, %v2590_v26  ;;  %v350_v48 = vrot.slane %v226_v13, %v2570_v18  ;;  %v354_v49 = vrot.slane %v226_v13, %v2573_v19  ;;  %v998_v50 = vpop.xlane.xlu1 %997 }
  0xee   : > { %v628_v51 = vrot.slane %v600_v40, %v2590_v26  ;;  %v629_v52 = vcombine.low %v607_v41, %v614_v42  ;;  %v358_v53 = vrot.slane %v226_v13, %v2576_v20  ;;  %v362_v54 = vrot.slane %v226_v13, %v2579_v21 }
  0xef   : > { %v596_v55 = vcombine.low %v588_v34, %v595_v46  ;;  %v366_v56 = vrot.slane %v226_v13, %v2582_v22  ;;  %v370_v58 = vrot.slane %v226_v13, %v2585_v23  ;;  %v646_v59 = vcombine.low %v342_v36, %v346_v45 }
  0xf0   : > { %v630_v60 = vcombine.low %v621_v47, %v628_v51  ;;  %v637_v61 = vrot.slane %v629_v52, %v2590_v26  ;;  %v647_v62 = vcombine.low %v350_v48, %v354_v49  ;;  %v648_v63 = vcombine.low %v358_v53, %v362_v54 }
  0xf1   : > { %895 = vperm.xlu1 %2203, %v596_v55   ;;  %v649_v0 = vcombine.low %v366_v56, %v370_v58  ;;  %v656_v1 = vrot.slane %v646_v59, %v2590_v26  ;;  %v1144_v2 = vrot.slane %v998_v50, %v2564_v16  ;;  %v1148_v3 = vrot.slane %v998_v50, %v2567_v17  ;;  %v1000_v40 = vpop.xlane.xlu1 %999 }
  0xf2   : > { %v644_v4 = vrot.slane %v630_v60, %v2590_v26  ;;  %v663_v5 = vrot.slane %v647_v62, %v2590_v26  ;;  %v670_v6 = vrot.slane %v648_v63, %v2590_v26  ;;  %v1152_v7 = vrot.slane %v998_v50, %v2570_v18 }
  0xf3   : > { %v677_v8 = vrot.slane %v649_v0, %v2590_v26  ;;  %v1156_v9 = vrot.slane %v998_v50, %v2573_v19  ;;  %v1160_v10 = vrot.slane %v998_v50, %v2576_v20  ;;  %v1164_v13 = vrot.slane %v998_v50, %v2579_v21 }
  0xf4   : > { %v645_v15 = vcombine.low %v637_v61, %v644_v4  ;;  %v678_v25 = vcombine.low %v656_v1, %v663_v5  ;;  %v1168_v27 = vrot.slane %v998_v50, %v2582_v22  ;;  %v1172_v28 = vrot.slane %v998_v50, %v2585_v23 }
  0xf5   : > { %v679_v29 = vcombine.low %v670_v6, %v677_v8  ;;  %v1465_v30 = vcombine.low %v1144_v2, %v1148_v3  ;;  %v1466_v31 = vcombine.low %v1152_v7, %v1156_v9  ;;  %v1467_v32 = vcombine.low %v1160_v10, %v1164_v13 }
  0xf6   : > { %898 = vperm.xlu1 %2203, %v645_v15   ;;  %v686_v33 = vrot.slane %v678_v25, %v2590_v26  ;;  %v1468_v34 = vcombine.low %v1168_v27, %v1172_v28  ;;  %v1032_v35 = vrot.slane %v2587_v24, %v2576_v20  ;;  %v1036_v36 = vrot.slane %v2587_v24, %v2579_v21  ;;  %v1002_v28 = vpop.xlane.xlu1 %1001 }
  0xf7   : > { %v693_v41 = vrot.slane %v679_v29, %v2590_v26  ;;  %v1475_v42 = vrot.slane %v1465_v30, %v2590_v26  ;;  %v1482_v45 = vrot.slane %v1466_v31, %v2590_v26  ;;  %v1489_v46 = vrot.slane %v1467_v32, %v2590_v26 }
  0xf8   : > { %v1496_v47 = vrot.slane %v1468_v34, %v2590_v26  ;;  %v1040_v48 = vrot.slane %v2587_v24, %v2582_v22  ;;  %v1044_v49 = vrot.slane %v2587_v24, %v2585_v23  ;;  %v1269_v50 = vcombine.low %v1016_v37, %v1020_v38 }
  0xf9   : > { %v694_v51 = vcombine.low %v686_v33, %v693_v41  ;;  %v1497_v52 = vcombine.low %v1475_v42, %v1482_v45  ;;  %v1270_v53 = vcombine.low %v1024_v43, %v1028_v44  ;;  %v1271_v54 = vcombine.low %v1032_v35, %v1036_v36 }
  0xfa   : > { %v1498_v55 = vcombine.low %v1489_v46, %v1496_v47  ;;  %v1272_v56 = vcombine.low %v1040_v48, %v1044_v49  ;;  %v1279_v58 = vrot.slane %v1269_v50, %v2590_v26  ;;  %v1176_v59 = vrot.slane %v1000_v40, %v2564_v16 }
  0xfb   : > { %901 = vperm.xlu1 %2203, %v694_v51   ;;  %v1505_v60 = vrot.slane %v1497_v52, %v2590_v26  ;;  %v1286_v37 = vrot.slane %v1270_v53, %v2590_v26  ;;  %v1293_v38 = vrot.slane %v1271_v54, %v2590_v26  ;;  %v1180_v61 = vrot.slane %v1000_v40, %v2567_v17 }
  0xfc   : > { %v1512_v62 = vrot.slane %v1498_v55, %v2590_v26  ;;  %v1300_v24 = vrot.slane %v1272_v56, %v2590_v26  ;;  %v1184_v43 = vrot.slane %v1000_v40, %v2570_v18  ;;  %v1188_v44 = vrot.slane %v1000_v40, %v2573_v19 }
  0xfd   : > { %v1301_v63 = vcombine.low %v1279_v58, %v1286_v37  ;;  %v1192_v0 = vrot.slane %v1000_v40, %v2576_v20  ;;  %v1196_v1 = vrot.slane %v1000_v40, %v2579_v21  ;;  %v1200_v2 = vrot.slane %v1000_v40, %v2582_v22 }
  0xfe   : > { %v1513_v3 = vcombine.low %v1505_v60, %v1512_v62  ;;  %v1302_v4 = vcombine.low %v1293_v38, %v1300_v24  ;;  %v1204_v5 = vrot.slane %v1000_v40, %v2585_v23  ;;  %v1514_v6 = vcombine.low %v1176_v59, %v1180_v61 }
  0xff   : > { %v1309_v7 = vrot.slane %v1301_v63, %v2590_v26  ;;  %v1515_v8 = vcombine.low %v1184_v43, %v1188_v44  ;;  %v1516_v9 = vcombine.low %v1192_v0, %v1196_v1  ;;  %v1048_v10 = vrot.slane %v2604_v39, %v2564_v16 }
 0x100   : > { %1674 = vperm.xlu0 %2202, %v1513_v3   ;;  %v1316_v13 = vrot.slane %v1302_v4, %v2590_v26  ;;  %v1517_v15 = vcombine.low %v1200_v2, %v1204_v5  ;;  %v1524_v25 = vrot.slane %v1514_v6, %v2590_v26  ;;  %v1052_v27 = vrot.slane %v2604_v39, %v2567_v17 }
 0x101   : > { %v1531_v29 = vrot.slane %v1515_v8, %v2590_v26  ;;  %v1538_v30 = vrot.slane %v1516_v9, %v2590_v26  ;;  %v1056_v31 = vrot.slane %v2604_v39, %v2570_v18  ;;  %v1060_v32 = vrot.slane %v2604_v39, %v2573_v19  ;;  %v1004_v9 = vpop.xlane.xlu1 %1003 }
 0x102   : > { %v1317_v33 = vcombine.low %v1309_v7, %v1316_v13  ;;  %v1545_v34 = vrot.slane %v1517_v15, %v2590_v26  ;;  %v1064_v35 = vrot.slane %v2604_v39, %v2576_v20  ;;  %v1068_v36 = vrot.slane %v2604_v39, %v2579_v21 }
 0x103   : > { %v1546_v40 = vcombine.low %v1524_v25, %v1531_v29  ;;  %v1072_v41 = vrot.slane %v2604_v39, %v2582_v22  ;;  %v1076_v42 = vrot.slane %v2604_v39, %v2585_v23  ;;  %v1318_v45 = vcombine.low %v1048_v10, %v1052_v27 }
 0x104   : > { %1662 = vperm.xlu1 %2203, %v1317_v33   ;;  %v1547_v46 = vcombine.low %v1538_v30, %v1545_v34  ;;  %v1319_v47 = vcombine.low %v1056_v31, %v1060_v32  ;;  %v1320_v48 = vcombine.low %v1064_v35, %v1068_v36  ;;  %v1208_v49 = vrot.slane %v1002_v28, %v2564_v16 }
 0x105   : > { %v1554_v50 = vrot.slane %v1546_v40, %v2590_v26  ;;  %v1321_v51 = vcombine.low %v1072_v41, %v1076_v42  ;;  %v1328_v52 = vrot.slane %v1318_v45, %v2590_v26  ;;  %v1212_v53 = vrot.slane %v1002_v28, %v2567_v17 }
 0x106   : > { %v1561_v54 = vrot.slane %v1547_v46, %v2590_v26  ;;  %v1335_v55 = vrot.slane %v1319_v47, %v2590_v26  ;;  %v1342_v39 = vrot.slane %v1320_v48, %v2590_v26  ;;  %v1216_v56 = vrot.slane %v1002_v28, %v2570_v18 }
 0x107   : > { %v1349_v58 = vrot.slane %v1321_v51, %v2590_v26  ;;  %v1220_v59 = vrot.slane %v1002_v28, %v2573_v19  ;;  %v1224_v60 = vrot.slane %v1002_v28, %v2576_v20  ;;  %v1228_v37 = vrot.slane %v1002_v28, %v2579_v21 }
 0x108   : > { %v1562_v38 = vcombine.low %v1554_v50, %v1561_v54  ;;  %v1350_v61 = vcombine.low %v1328_v52, %v1335_v55  ;;  %v1232_v62 = vrot.slane %v1002_v28, %v2582_v22  ;;  %v1236_v24 = vrot.slane %v1002_v28, %v2585_v23 }
 0x109   : > { %v1351_v43 = vcombine.low %v1342_v39, %v1349_v58  ;;  %v1563_v44 = vcombine.low %v1208_v49, %v1212_v53  ;;  %v1564_v63 = vcombine.low %v1216_v56, %v1220_v59  ;;  %v1565_v0 = vcombine.low %v1224_v60, %v1228_v37  ;;  %v228_v59 = vpop.xlane.xlu0 %227 }
 0x10a   : > { %1677 = vperm.xlu0 %2202, %v1562_v38   ;;  %v1358_v1 = vrot.slane %v1350_v61, %v2590_v26  ;;  %v1566_v2 = vcombine.low %v1232_v62, %v1236_v24  ;;  %v1080_v3 = vrot.slane %v2621_v57, %v2564_v16  ;;  %v1084_v4 = vrot.slane %v2621_v57, %v2567_v17 }
 0x10b   : > { %v1365_v5 = vrot.slane %v1351_v43, %v2590_v26  ;;  %v1573_v6 = vrot.slane %v1563_v44, %v2590_v26  ;;  %v1580_v7 = vrot.slane %v1564_v63, %v2590_v26  ;;  %v1587_v8 = vrot.slane %v1565_v0, %v2590_v26 }
 0x10c   : > { %v1594_v10 = vrot.slane %v1566_v2, %v2590_v26  ;;  %v1088_v13 = vrot.slane %v2621_v57, %v2570_v18  ;;  %v1092_v15 = vrot.slane %v2621_v57, %v2573_v19  ;;  %v1096_v25 = vrot.slane %v2621_v57, %v2576_v20 }
 0x10d   : > { %v1366_v27 = vcombine.low %v1358_v1, %v1365_v5  ;;  %v1595_v28 = vcombine.low %v1573_v6, %v1580_v7  ;;  %v1100_v29 = vrot.slane %v2621_v57, %v2579_v21  ;;  %v1104_v30 = vrot.slane %v2621_v57, %v2582_v22 }
 0x10e   : > { %v1596_v31 = vcombine.low %v1587_v8, %v1594_v10  ;;  %v1108_v32 = vrot.slane %v2621_v57, %v2585_v23  ;;  %v1367_v33 = vcombine.low %v1080_v3, %v1084_v4  ;;  %v1368_v34 = vcombine.low %v1088_v13, %v1092_v15 }
 0x10f   : > { %1665 = vperm.xlu1 %2203, %v1366_v27   ;;  %v1603_v35 = vrot.slane %v1595_v28, %v2590_v26  ;;  %v1369_v36 = vcombine.low %v1096_v25, %v1100_v29  ;;  %v1240_v40 = vrot.slane %v1004_v9, %v2564_v16  ;;  %v1244_v41 = vrot.slane %v1004_v9, %v2567_v17  ;;  %v230_v28 = vpop.xlane.xlu0 %229 }
 0x110   : > { %v1610_v42 = vrot.slane %v1596_v31, %v2590_v26  ;;  %v1370_v45 = vcombine.low %v1104_v30, %v1108_v32  ;;  %v1377_v46 = vrot.slane %v1367_v33, %v2590_v26  ;;  %v1384_v47 = vrot.slane %v1368_v34, %v2590_v26 }
 0x111   : > { %v1391_v48 = vrot.slane %v1369_v36, %v2590_v26  ;;  %v1248_v57 = vrot.slane %v1004_v9, %v2570_v18  ;;  %v1252_v49 = vrot.slane %v1004_v9, %v2573_v19  ;;  %v1256_v50 = vrot.slane %v1004_v9, %v2576_v20 }
 0x112   : > { %v1611_v51 = vcombine.low %v1603_v35, %v1610_v42  ;;  %v1398_v52 = vrot.slane %v1370_v45, %v2590_v26  ;;  %v1399_v53 = vcombine.low %v1377_v46, %v1384_v47  ;;  %v1260_v54 = vrot.slane %v1004_v9, %v2579_v21 }
 0x113   : > { %v1264_v55 = vrot.slane %v1004_v9, %v2582_v22  ;;  %v1268_v39 = vrot.slane %v1004_v9, %v2585_v23  ;;  %v1612_v56 = vcombine.low %v1240_v40, %v1244_v41  ;;  %v1613_v58 = vcombine.low %v1248_v57, %v1252_v49 }
 0x114   : > { %1680 = vperm.xlu0 %2202, %v1611_v51   ;;  %v1400_v60 = vcombine.low %v1391_v48, %v1398_v52  ;;  %v1407_v37 = vrot.slane %v1399_v53, %v2590_v26  ;;  %v1614_v38 = vcombine.low %v1256_v50, %v1260_v54  ;;  %v1112_v61 = vrot.slane %v2634_v12, %v2564_v16 }
 0x115   : > { %v1615_v62 = vcombine.low %v1264_v55, %v1268_v39  ;;  %v1622_v24 = vrot.slane %v1612_v56, %v2590_v26  ;;  %v1629_v43 = vrot.slane %v1613_v58, %v2590_v26  ;;  %v1116_v44 = vrot.slane %v2634_v12, %v2567_v17  ;;  %v232_v39 = vpop.xlane.xlu0 %231 }
 0x116   : > { %v1414_v63 = vrot.slane %v1400_v60, %v2590_v26  ;;  %v1636_v0 = vrot.slane %v1614_v38, %v2590_v26  ;;  %v1120_v1 = vrot.slane %v2634_v12, %v2570_v18  ;;  %v1124_v2 = vrot.slane %v2634_v12, %v2573_v19 }
 0x117   : > { %v1643_v3 = vrot.slane %v1615_v62, %v2590_v26  ;;  %v1644_v4 = vcombine.low %v1622_v24, %v1629_v43  ;;  %v1128_v5 = vrot.slane %v2634_v12, %v2576_v20  ;;  %v1132_v6 = vrot.slane %v2634_v12, %v2579_v21 }
 0x118   : > { %v1415_v7 = vcombine.low %v1407_v37, %v1414_v63  ;;  %v1136_v8 = vrot.slane %v2634_v12, %v2582_v22  ;;  %v1140_v9 = vrot.slane %v2634_v12, %v2585_v23  ;;  %v1416_v10 = vcombine.low %v1112_v61, %v1116_v44 }
 0x119   : > { %v1645_v13 = vcombine.low %v1636_v0, %v1643_v3  ;;  %v1652_v15 = vrot.slane %v1644_v4, %v2590_v26  ;;  %v1417_v25 = vcombine.low %v1120_v1, %v1124_v2  ;;  %v1418_v27 = vcombine.low %v1128_v5, %v1132_v6 }
 0x11a   : > { %1668 = vperm.xlu1 %2203, %v1415_v7   ;;  %v1419_v29 = vcombine.low %v1136_v8, %v1140_v9  ;;  %v1426_v30 = vrot.slane %v1416_v10, %v2590_v26  ;;  %v374_v31 = vrot.slane %v228_v59, %v2564_v16  ;;  %v378_v32 = vrot.slane %v228_v59, %v2567_v17 }
 0x11b   : > { %v1659_v33 = vrot.slane %v1645_v13, %v2590_v26  ;;  %v1433_v34 = vrot.slane %v1417_v25, %v2590_v26  ;;  %v1440_v12 = vrot.slane %v1418_v27, %v2590_v26  ;;  %v382_v35 = vrot.slane %v228_v59, %v2570_v18 }
 0x11c   : > { %v1447_v36 = vrot.slane %v1419_v29, %v2590_v26  ;;  %v386_v40 = vrot.slane %v228_v59, %v2573_v19  ;;  %v390_v41 = vrot.slane %v228_v59, %v2576_v20  ;;  %v394_v42 = vrot.slane %v228_v59, %v2579_v21 }
 0x11d   : > { %v1660_v45 = vcombine.low %v1652_v15, %v1659_v33  ;;  %v1448_v46 = vcombine.low %v1426_v30, %v1433_v34  ;;  %v398_v47 = vrot.slane %v228_v59, %v2582_v22  ;;  %v402_v48 = vrot.slane %v228_v59, %v2585_v23  ;;  %v234_v15 = vpop.xlane.xlu0 %233 }
 0x11e   : > { %v1449_v57 = vcombine.low %v1440_v12, %v1447_v36  ;;  %v695_v49 = vcombine.low %v374_v31, %v378_v32  ;;  %v696_v50 = vcombine.low %v382_v35, %v386_v40  ;;  %v697_v51 = vcombine.low %v390_v41, %v394_v42 }
 0x11f   : > { %1683 = vperm.xlu0 %2202, %v1660_v45   ;;  %v1456_v52 = vrot.slane %v1448_v46, %v2590_v26  ;;  %v698_v53 = vcombine.low %v398_v47, %v402_v48  ;;  %v406_v54 = vrot.slane %v230_v28, %v2564_v16  ;;  %v410_v55 = vrot.slane %v230_v28, %v2567_v17 }
 0x120   : > { %v1463_v56 = vrot.slane %v1449_v57, %v2590_v26  ;;  %v705_v58 = vrot.slane %v695_v49, %v2590_v26  ;;  %v712_v60 = vrot.slane %v696_v50, %v2590_v26  ;;  %v719_v59 = vrot.slane %v697_v51, %v2590_v26 }
 0x121   : > { %v726_v37 = vrot.slane %v698_v53, %v2590_v26  ;;  %v414_v38 = vrot.slane %v230_v28, %v2570_v18  ;;  %v418_v61 = vrot.slane %v230_v28, %v2573_v19  ;;  %v422_v62 = vrot.slane %v230_v28, %v2576_v20 }
 0x122   : > { %v1464_v24 = vcombine.low %v1456_v52, %v1463_v56  ;;  %v727_v43 = vcombine.low %v705_v58, %v712_v60  ;;  %v426_v44 = vrot.slane %v230_v28, %v2579_v21  ;;  %v430_v63 = vrot.slane %v230_v28, %v2582_v22 }
 0x123   : > { %v728_v0 = vcombine.low %v719_v59, %v726_v37  ;;  %v434_v1 = vrot.slane %v230_v28, %v2585_v23  ;;  %v744_v2 = vcombine.low %v406_v54, %v410_v55  ;;  %v745_v3 = vcombine.low %v414_v38, %v418_v61 }
 0x124   : > { %1671 = vperm.xlu1 %2203, %v1464_v24   ;;  %v735_v4 = vrot.slane %v727_v43, %v2590_v26  ;;  %v746_v5 = vcombine.low %v422_v62, %v426_v44  ;;  %v438_v6 = vrot.slane %v232_v39, %v2564_v16  ;;  %v442_v7 = vrot.slane %v232_v39, %v2567_v17 }
 0x125   : > { %v742_v8 = vrot.slane %v728_v0, %v2590_v26  ;;  %v747_v9 = vcombine.low %v430_v63, %v434_v1  ;;  %v754_v10 = vrot.slane %v744_v2, %v2590_v26  ;;  %v761_v13 = vrot.slane %v745_v3, %v2590_v26 }
 0x126   : > { %v768_v25 = vrot.slane %v746_v5, %v2590_v26  ;;  %v446_v27 = vrot.slane %v232_v39, %v2570_v18  ;;  %v450_v28 = vrot.slane %v232_v39, %v2573_v19  ;;  %v454_v29 = vrot.slane %v232_v39, %v2576_v20 }
 0x127   : > { %v743_v30 = vcombine.low %v735_v4, %v742_v8  ;;  %v775_v31 = vrot.slane %v747_v9, %v2590_v26  ;;  %v776_v32 = vcombine.low %v754_v10, %v761_v13  ;;  %v458_v33 = vrot.slane %v232_v39, %v2579_v21 }
 0x128   : > { %v462_v34 = vrot.slane %v232_v39, %v2582_v22  ;;  %v466_v12 = vrot.slane %v232_v39, %v2585_v23  ;;  %v793_v35 = vcombine.low %v438_v6, %v442_v7  ;;  %v794_v36 = vcombine.low %v446_v27, %v450_v28 }
 0x129   : > { %904 = vperm.xlu1 %2203, %v743_v30   ;;  %v777_v40 = vcombine.low %v768_v25, %v775_v31  ;;  %v784_v41 = vrot.slane %v776_v32, %v2590_v26  ;;  %v795_v42 = vcombine.low %v454_v29, %v458_v33  ;;  %v470_v45 = vrot.slane %v234_v15, %v2564_v16 }
 0x12a   : > { %v796_v46 = vcombine.low %v462_v34, %v466_v12  ;;  %v803_v47 = vrot.slane %v793_v35, %v2590_v26  ;;  %v810_v48 = vrot.slane %v794_v36, %v2590_v26  ;;  %v474_v57 = vrot.slane %v234_v15, %v2567_v17 }
 0x12b   : > { %v791_v49 = vrot.slane %v777_v40, %v2590_v26  ;;  %v817_v50 = vrot.slane %v795_v42, %v2590_v26  ;;  %v478_v51 = vrot.slane %v234_v15, %v2570_v18  ;;  %v482_v52 = vrot.slane %v234_v15, %v2573_v19 }
 0x12c   : > { %v824_v53 = vrot.slane %v796_v46, %v2590_v26  ;;  %v825_v54 = vcombine.low %v803_v47, %v810_v48  ;;  %v486_v55 = vrot.slane %v234_v15, %v2576_v20  ;;  %v490_v39 = vrot.slane %v234_v15, %v2579_v21 }
 0x12d   : > { %v792_v56 = vcombine.low %v784_v41, %v791_v49  ;;  %v494_v58 = vrot.slane %v234_v15, %v2582_v22  ;;  %v498_v17 = vrot.slane %v234_v15, %v2585_v23  ;;  %v842_v60 = vcombine.low %v470_v45, %v474_v57 }
 0x12e   : > { %v826_v59 = vcombine.low %v817_v50, %v824_v53  ;;  %v833_v37 = vrot.slane %v825_v54, %v2590_v26  ;;  %v843_v38 = vcombine.low %v478_v51, %v482_v52  ;;  %v844_v18 = vcombine.low %v486_v55, %v490_v39 }
 0x12f   : > { %907 = vperm.xlu1 %2203, %v792_v56   ;;  %v845_v19 = vcombine.low %v494_v58, %v498_v17  ;;  %v852_v61 = vrot.slane %v842_v60, %v2590_v26  ;;  %v916_v8 = vand.u32 127, %v243_v11  ;;  %v988_v60 = vld [vmem:[#allocation3] sm:$0x1] }
 0x130   : > { %v840_v62 = vrot.slane %v826_v59, %v2590_v26  ;;  %v859_v20 = vrot.slane %v843_v38, %v2590_v26  ;;  %v866_v21 = vrot.slane %v844_v18, %v2590_v26 }
 0x131   : > { %v873_v22 = vrot.slane %v845_v19, %v2590_v26  ;;  %v921_v10 = vadd.s32 4294967288, %v916_v8  ;;  %v928_v13 = vadd.s32 4294967280, %v916_v8  ;;  %v942_v15 = vadd.s32 4294967264, %v916_v8 }
 0x132   : > { %v841_v24 = vcombine.low %v833_v37, %v840_v62  ;;  %v874_v23 = vcombine.low %v852_v61, %v859_v20  ;;  %v935_v28 = vadd.s32 4294967272, %v916_v8  ;;  %v949_v29 = vadd.s32 4294967256, %v916_v8 }
 0x133   : > { %v875_v43 = vcombine.low %v866_v21, %v873_v22  ;;  %v924_v27 = vsub.s32 %v921_v10, %v2561_v14  ;;  %v931_v30 = vsub.s32 %v928_v13, %v2561_v14  ;;  %v945_v31 = vsub.s32 %v942_v15, %v2561_v14  ;;  %v1757_v10 = vld [vmem:[%s3002_s1 + $0x8] sm:$0xff] (!%p2035_p7)  ;;  %v1758_v13 = vld [vmem:[%s3002_s1 + $0x10] sm:$0xff] (!%p2035_p7) }
 0x134   : > { %910 = vperm.xlu1 %2203, %v841_v24   ;;  %v882_v44 = vrot.slane %v874_v23, %v2590_v26  ;;  %v956_v32 = vadd.s32 4294967248, %v916_v8  ;;  %v919_v34 = vsub.s32 %v916_v8, %v2561_v14  ;;  %v963_v35 = vadd.s32 4294967240, %v916_v8 }
 0x135   : > { %v889_v63 = vrot.slane %v875_v43, %v2590_v26  ;;  %v938_v36 = vsub.s32 %v935_v28, %v2561_v14  ;;  %v952_v41 = vsub.s32 %v949_v29, %v2561_v14  ;;  %v2370_v15 = vmov (!%p2035_p7), 0.0|0.0   ;;  %v1760_v29 = vld [vmem:[%s3002_s1 + $0x20] sm:$0xff] (!%p2035_p7) }
 0x136   : > { %v959_v45 = vsub.s32 %v956_v32, %v2561_v14  ;;  %v966_v57 = vsub.s32 %v963_v35, %v2561_v14  ;;  %2078 = vmatprep.subr.bf16.mxu0 (!%p2035_p7), %v2370_v15 }
 0x137   : > { %v890_v0 = vcombine.low %v882_v44, %v889_v63 }
 0x139   : > { %913 = vperm.xlu1 %2203, %v890_v0  }
 0x16a   : > { %v2872_v4 = vpop.permute.xlu0 %892 }
 0x16b   : > { %v920_v61 = vrot.slane %v2872_v4, %v919_v34 }
 0x170   : > { %v2866_v1 = vpop.permute.xlu1 %895 }
 0x171   : > { %v925_v18 = vrot.slane %v2866_v1, %v924_v27 }
 0x173   : > { %v927_v22 = vsel %vm926_vm1, %v925_v18, %v920_v61 }
 0x175   : > { %v2868_v2 = vpop.permute.xlu1 %898 }
 0x176   : > { %v932_v19 = vrot.slane %v2868_v2, %v931_v30 }
 0x178   : > { %v934_v23 = vsel %vm933_vm2, %v932_v19, %v927_v22 }
 0x17a   : > { %v2870_v3 = vpop.permute.xlu1 %901 }
 0x17b   : > { %v939_v62 = vrot.slane %v2870_v3, %v938_v36 }
 0x17d   : > { %v941_v44 = vsel %vm940_vm4, %v939_v62, %v934_v23 }
 0x17f   : > { %v1675_v6 = vpop.permute.xlu0 %1674 }
 0x180   : > { %v1707_v42 = vrot.slane %v1675_v6, %v945_v31  ;;  %v218_v6 = vld [vmem:[#allocation2] sm:$0x1] }
 0x183   : > { %v1663_v5 = vpop.permute.xlu1 %1662 }
 0x184   : > { %v1688_v40 = vrot.slane %v1663_v5, %v919_v34  ;;  %v1762_v34 = vld [vmem:[%s3002_s1 + $0x30] sm:$0xff] (!%p2035_p7) }
 0x189   : > { %v1678_v9 = vpop.permute.xlu0 %1677 }
 0x18a   : > { %v1712_v51 = vrot.slane %v1678_v9, %v952_v41  ;;  %v1756_v9 = vld [vmem:[%s3002_s1] sm:$0xff] (!%p2035_p7) }
 0x18e   : > { %v1666_v7 = vpop.permute.xlu1 %1665 }
 0x18f   : > { %v1692_v12 = vrot.slane %v1666_v7, %v924_v27  ;;  %v2372_v27 = vmov (!%p2035_p7), 0.0  }
 0x190   : > { %2070 = vmatprep.mubr.msk.f32.mxu0 (!%p2035_p7), %vm2371_vm9, %v2372_v27  ;;  %2073 = vmatprep.subr.mxu1 (!%p2035_p7), %v2372_v27 }
 0x191   : > { %v1693_v47 = vsel %vm926_vm1, %v1692_v12, %v1688_v40  ;;  %2075 = vmatprep.mubr.msk.f32.mxu1 (!%p2035_p7), %vm2371_vm9, %v2372_v27  ;;  %v1763_v12 = vld [vmem:[%s3002_s1 + $0x38] sm:$0xff] (!%p2035_p7) }
 0x192   : > { %v2088_v35 = vpack.c.bf16 (!%p2035_p7), %v1763_v12, %v1762_v34 }
 0x193   : > { %v1681_v33 = vpop.permute.xlu0 %1680 }
 0x194   : > { %v1717_v53 = vrot.slane %v1681_v33, %v959_v45 }
 0x199   : > { %v1669_v25 = vpop.permute.xlu1 %1668 }
 0x19a   : > { %v1697_v11 = vrot.slane %v1669_v25, %v931_v30  ;;  %v1759_v25 = vld [vmem:[%s3002_s1 + $0x18] sm:$0xff] (!%p2035_p7)  ;;  %v1761_v30 = vld [vmem:[%s3002_s1 + $0x28] sm:$0xff] (!%p2035_p7) }
 0x19b   : > { %v2082_v28 = vpack.c.bf16 (!%p2035_p7), %v1759_v25, %v1758_v13  ;;  %v2085_v32 = vpack.c.bf16 (!%p2035_p7), %v1761_v30, %v1760_v29 }
 0x19c   : > { %v1698_v49 = vsel %vm933_vm2, %v1697_v11, %v1693_v47 }
 0x19e   : > { %v1684_v50 = vpop.permute.xlu0 %1683 }
 0x19f   : > { %v1722_v39 = vrot.slane %v1684_v50, %v966_v57 }
 0x1a3   : > { %v1672_v46 = vpop.permute.xlu1 %1671 }
 0x1a4   : > { %v1702_v48 = vrot.slane %v1672_v46, %v938_v36 }
 0x1a6   : > { %v1703_v52 = vsel %vm940_vm4, %v1702_v48, %v1698_v49 }
 0x1a7   : > { %v1708_v54 = vsel %vm947_vm3, %v1707_v42, %v1703_v52 }
 0x1a8   : > { %v1713_v55 = vsel %vm954_vm5, %v1712_v51, %v1708_v54  ;;  %v905_v56 = vpop.permute.xlu1 %904 }
 0x1a9   : > { %v1718_v58 = vsel %vm961_vm6, %v1717_v53, %v1713_v55  ;;  %v946_v21 = vrot.slane %v905_v56, %v945_v31 }
 0x1aa   : > { %v1723_v14 = vsel %vm968_vm7, %v1722_v39, %v1718_v58 }
 0x1ab   : > { %v1730_v17 = vrot.slane %v1723_v14, %v2590_v26  ;;  %v948_v63 = vsel %vm947_vm3, %v946_v21, %v941_v44 }
 0x1ad   : > { %v1737_v59 = vrot.slane %v1730_v17, %v2590_v26 }
 0x1ae   : > { %v908_v37 = vpop.permute.xlu1 %907 }
 0x1af   : > { %v1739_v38 = vadd.f32 %v1737_v59, %v988_v60  ;;  %v953_v24 = vrot.slane %v908_v37, %v952_v41  ;;  %v1764_v41 = vld [vmem:[%s3003_s2] sm:$0xf] (!%p2035_p7) }
 0x1b0   : > { %2074 = vmatpush3.msk.msra.mxu1 (!%p2035_p7), %vm1844_vm12, %v1764_v41 }
 0x1b1   : > { %1740 = vst.msk [vmem:[#allocation3] sm:$0x1] %vm986_vm8, %v1739_v38  ;;  %v955_v1 = vsel %vm954_vm5, %v953_v24, %v948_v63 }
 0x1b3   : > { %v911_v20 = vpop.permute.xlu1 %910 }
 0x1b4   : > { %v960_v43 = vrot.slane %v911_v20, %v959_v45 }
 0x1b6   : > { %v962_v4 = vsel %vm961_vm6, %v960_v43, %v955_v1 }
 0x1b8   : > { %v914_v0 = vpop.permute.xlu1 %913  ;;  %v1746_v31 = vld [vmem:[#allocation3] sm:$0x1] (!%p2035_p7) }
 0x1b9   : > { %v967_v2 = vrot.slane %v914_v0, %v966_v57  ;;  %v1747_v33 = vmul.f32 (!%p2035_p7), 0.00390625, %v1746_v31 }
 0x1bb   : > { %v969_v3 = vsel %vm968_vm7, %v967_v2, %v962_v4  ;;  %v1752_v11 = vrot.slane (!%p2035_p7), %v1747_v33, %v2564_v16 }
 0x1bc   : > { %v976_v5 = vrot.slane %v969_v3, %v2590_v26  ;;  %1744 = sbr.rel (%p2035_p7) target bundleno = 929 (0x3a1), region = 44 }
 0x1be   : > { %v983_v7 = vrot.slane %v976_v5, %v2590_v26  ;;  %v2079_v26 = vpack.c.bf16 (!%p2035_p7), %v1757_v10, %v1756_v9 }
 0x1c0   : > { %v985_v8 = vmax.f32 %v218_v6, %v983_v7  ;;  %2080 = vmatpush3.bf16.msra.mxu0 (!%p2035_p7), %v2079_v26 }
 0x1c1   : > { %2081 = vmatprep.subr.bf16.mxu0 (!%p2035_p7), %v2370_v15 }
 0x1c2   : > { %987 = vst.msk [vmem:[#allocation2] sm:$0x1] %vm986_vm8, %v985_v8 }
 0x1c4   : > { %2083 = vmatpush3.bf16.msra.mxu0 %v2082_v28 }
 0x1c5   : > { %2084 = vmatprep.subr.bf16.mxu0 %v2370_v15 }
 0x1c8   : > { %2086 = vmatpush3.bf16.msra.mxu0 %v2085_v32 }
 0x1c9   : > { %2087 = vmatprep.subr.bf16.mxu0 %v2370_v15  ;;  %v1745_v36 = vld [vmem:[#allocation2] sm:$0x1] }
 0x1ca   : > { %v1755_v40 = vsel %vm1754_vm10, %v1745_v36, %v1752_v11 }
 0x1cc   : > { %2089 = vmatpush3.bf16.msra.mxu0 %v2088_v35 }
 0x1cf   : > { %2071 = vmatmul.mubr.msk.f32.vlgmr.msra.gmra.mrb[0].mxu0 %vm1765_vm11, %v1755_v40 }
 0x2a2   : > { %v1835_v42 = vpop.f32.mrb[0].mxu0 }
 0x2a3   : > { %v1839_v45 = vmax.f32 %v1835_v42, 0.0  ;;  %v2072_v46 = vpop.f32.mrb[1].mxu0 }
 0x2a5   : > { %2076 = vmatmul.mubr.msk.f32.vlgmr.msra.gmra.mrb[0].mxu1 %vm1840_vm13, %v1839_v45 }
 0x378   : > { %v1914_v16 = vpop.f32.mrb[0].mxu1 }
 0x379   : > { %v1919_v47 = vsel %vm1918_vm14, %v1914_v16, 0.0  ;;  %v2077_v48 = vpop.f32.mrb[1].mxu1 }
 0x37a   : > { %v1920_v57 = vrot.slane %v1919_v47, 4 }
 0x37c   : > { %v1921_v49 = vadd.f32 %v1920_v57, %v1919_v47 }
 0x37e   : > { %v1922_v50 = vrot.slane %v1921_v49, 2 }
 0x380   : > { %v1923_v51 = vadd.f32 %v1922_v50, %v1921_v49 }
 0x382   : > { %v1924_v52 = vrot.slane %v1923_v51, 1 }
 0x384   : > { %v1925_v53 = vadd.f32 %v1924_v52, %v1923_v51 }
 0x386   : > { %v2039_v54 = vmul.f32 -1.442695, %v1925_v53 }
 0x388   : > { %2204 = vpow2.f32 %v2039_v54 }
 0x392   : > { %v2205_v55 = vpop.eup %2204 }
 0x393   : > { %v1929_v39 = vadd.f32 1.0, %v2205_v55 }
 0x395   : > { %2206 = vrcp.f32 %v1929_v39 }
 0x39f   : > { %v2207_v56 = vpop.eup %2206 }
 0x3a0   : > { %1932 = vst.msk [vmem:[%s2549_s6] sm:$0x1] %vm986_vm8, %v2207_v56 }
 0x3a1 PF: > { %s2040_s28 = sshll.u32 %s2348_s19, 4  ;;  %s1946_s30 = sshll.u32 %s2549_s6, 4  ;;  %s1947_s30 = int_to_ptr.vmem [resolvable:$true] %s1946_s30 }
 0x3a2   : > { %s2942_s11 = scalar_lea.hbm %s3004_s3, %s2040_s28  ;;  %s1934_s25 = scalar_lea.sflag [#allocation6], %s201_s24 }
 0x3a3   : > { %s2238_s4 = scalar_lea.vmem %s1947_s30, 16  ;;  %p3015_p4 = scmp.ne.s32.totalorder %s3012_s7, 0 }
 0x3a4   : > { %p2239_p2 = scmp.ne.s32.totalorder %s1947_s30, %s2238_s4  ;;  %s2373_s27 = smov [#allocation7]  }
 0x3a5   : > { %s2242_s15 = sshll.u32 %s2373_s27, 4  ;;  %s2243_s15 = int_to_ptr.vmem [resolvable:$false] %s2242_s15 }
 0x3a6   : > { %p2240_p0 = pnand %p2239_p2, %p3015_p4  ;;  %s2244_s26 = scalar_lea.vmem %s2243_s15, 32 }
 0x3a7   : > { %p2245_p5 = scmp.lt.s32.totalorder %s1947_s30, %s2243_s15  ;;  %p2246_p8 = scmp.lt.s32.totalorder %s2244_s26, %s2238_s4 }
 0x3a8   : > { %p2241_p1 = pneg %p2240_p0 }
 0x3a9   : > { %p2247_p3 = por %p2246_p8, %p2245_p5 }
 0x3ab   : > { %p2248_p10 = pnand %p2247_p3, %p2241_p1 }
 0x3ad   : > { %2251 = shalt.err (!%p2248_p10)
}
 0x3ae   : > { %s2252_s19 = scalar_lea.hbm %s2942_s11, 16  ;;  %s2256_s23 = scalar_lea.hbm %s3004_s3, 32 }
 0x3af   : > { %p2253_p11 = scmp.ne.s32.totalorder %s2942_s11, %s2252_s19  ;;  %p2257_p13 = scmp.lt.u32.totalorder %s2942_s11, %s3004_s3 }
 0x3b0   : > { %p2258_p12 = scmp.lt.u32.totalorder %s2256_s23, %s2252_s19  ;;  %p2260_p2 = scmp.lt.u32.totalorder %s2252_s19, %s2942_s11 }
 0x3b1   : > { %p2254_p6 = pnand %p2253_p11, %p3015_p4 }
 0x3b2   : > { %p2259_p7 = por %p2258_p12, %p2257_p13 }
 0x3b3   : > { %p2255_p9 = pneg %p2254_p6 }
 0x3b4   : > { %p2261_p0 = por %p2260_p2, %p2259_p7 }
 0x3b6   : > { %p2262_p1 = pnand %p2261_p0, %p2255_p9 }
 0x3b8   : > { %2265 = shalt.err (!%p2262_p1)
}
 0x3b9   : > { %2092 = dma.vmem_to_hbm [thread:$0]  (%p3015_p4), %s1947_s30, 16, %s2942_s11, %s1934_s25  }
 0x3ba PF: > { %p2103_p5 = scmp.ge.s32.totalorder %s2360_s22, 2  ;;  %s1958_s5 = sand.u32 1, %s2320_s12  }
 0x3bb   : > { %p3016_p8 = scmp.ne.s32.totalorder %s3013_s10, 0  ;;  %s1959_s18 = scalar_lea.sflag [#allocation6], %s1958_s5 }
 0x3bd   : > { %p2099_p3 = pnand %p2103_p5, %p3016_p8 }
 0x3bf   : > { %2315 = dma.done.wait (!%p2099_p3), %s1959_s18, 16  }
 0x3c0   : > { %2317 = vsyncadd (!%p2099_p3), %s1959_s18, 4294967280  ;;  %s19_s22 = sadd.s32 1, %s2360_s22   ;;  %s3017_s7 = sld [smem:[#allocation10_spill]] }
 0x3c1   : > { %p16_p10 = scmp.ge.s32.totalorder %s19_s22, 6   ;;  %s3018_s11 = sld [smem:[#allocation11_spill]] }
 0x3c2   : > { %s3019_s12 = smov %s2324_s13  ;;  %s3020_s13 = smov %s2328_s14 }
 0x3c3   : > { %s3021_s14 = smov %s2481_s8  ;;  %s3022_s15 = smov %s2336_s16 }
 0x3c4   : > { %s3023_s16 = smov %s2340_s17  ;;  %s3024_s17 = smov %s2484_s9 }
 0x3c5   : > { %s3025_s18 = smov %s2352_s20  ;;  %s3026_s19 = smov %s2356_s21 }
 0x3c6   : > { %s3027_s20 = smov %s3017_s7  ;;  %18 = sbr.rel (!%p16_p10) target bundleno = 9 (0x9), region = 85 }
 0x3c7   : > { %s3028_s21 = smov %s3018_s11 }
 0x3cd   :  { %1963 = vsyncpa [#allocation5], 1 }
 0x3ce   :  { %1965 = vsyncpa [#allocation5 + $0x1], 1 }
 0x3cf   :  { %1966 = vsyncpa [#allocation6], 1 }
 0x3d0   :  { %1968 = vsyncpa [#allocation6 + $0x1], 1 }

</bundles_post_ra>
